<compile_context>
chip_gen: v5e
topology: v5e:2x2
jax: 0.10.0
libtpu: 0.0.40
codegen_flags: <defaults>
</compile_context>

<pallas_src>
import functools

import jax
import jax.numpy as jnp
from jax.experimental import pallas as pl
from jax.experimental.pallas import tpu as pltpu


def _round_up(x, m):
    return ((x + m - 1) // m) * m


def _choose_batch_tile(B, max_tile):
    if B <= max_tile:
        return B                      # single grid step, no per-step overhead
    # Even number of roughly-equal, lane-aligned (128) steps so the two v7x
    # TensorCores each get a balanced share under dimension_semantics=parallel.
    n_steps = 2 * pl.cdiv(B, 2 * max_tile)
    return _round_up(pl.cdiv(B, n_steps), 128)


def _ffnn_kernel(x_ref, w1t_ref, b1t_ref, w2t_ref, b2t_ref, o_ref, *,
                 num_classes, matmul_dtype):
    # x block: (TB, D).  Weights are pre-transposed/padded/cast in the wrapper.
    x = x_ref[...].astype(matmul_dtype)               # no-op for f32 default

    # ---- layer 1: z1T = W1^T @ x^T  -> (Hp, TB), f32 accumulate on the MXU ----
    z1t = jax.lax.dot_general(
        w1t_ref[...], x,
        dimension_numbers=(((1,), (1,)), ((), ())),   # contract D with D (A @ B^T)
        preferred_element_type=jnp.float32)
    z1t = jnp.tanh(z1t + b1t_ref[...])                # bias broadcast over lanes

    # ---- layer 2: z2T = W2^T @ z1T -> (Cp, TB) ----
    z2t = jnp.dot(w2t_ref[...], z1t.astype(matmul_dtype),
                  preferred_element_type=jnp.float32)
    z2t = jnp.tanh(z2t + b2t_ref[...])

    # ---- LogSoftmax over the class (sublane) axis ----
    # tanh output is in [-1, 1] -> exp cannot overflow, so no max subtraction.
    # Padded class sublanes (zero weights/bias -> tanh(0)=0) are masked out.
    cls = jax.lax.broadcasted_iota(jnp.int32, (z2t.shape[0], 1), 0)
    valid = cls < num_classes                         # (Cp, 1), broadcast below
    p = jnp.where(valid, jnp.exp(z2t), 0.0)
    lse = jnp.log(jnp.sum(p, axis=0, keepdims=True))  # (1, TB)
    o_ref[...] = (z2t - lse).astype(o_ref.dtype)      # padded sublanes sliced off outside


def ffnn_forward(x, w1, b1, w2, b2, *, max_batch_tile=2048,
                 matmul_dtype=jnp.float32):
    """x:(B,D), w1:(D,H), b1:(1,H)|(H,), w2:(H,C), b2:(1,C)|(C,) -> log-probs (B,C)."""
    B, D = x.shape
    H = w1.shape[1]
    C = w2.shape[1]

    Hp = _round_up(H, 8)      # sublane padding only (8), not lane padding (128)
    Cp = _round_up(C, 8)

    # Pad + transpose + cast the parameters once, wrapper-side (layout plumbing).
    w1t = jnp.zeros((Hp, D), matmul_dtype).at[:H, :].set(w1.T.astype(matmul_dtype))
    w2t = jnp.zeros((Cp, Hp), matmul_dtype).at[:C, :H].set(w2.T.astype(matmul_dtype))
    b1t = jnp.zeros((Hp, 1), jnp.float32).at[:H, 0].set(b1.reshape(-1))
    b2t = jnp.zeros((Cp, 1), jnp.float32).at[:C, 0].set(b2.reshape(-1))

    tb = _choose_batch_tile(B, max_batch_tile)
    grid = (pl.cdiv(B, tb),)

    kernel = functools.partial(_ffnn_kernel, num_classes=C,
                               matmul_dtype=matmul_dtype)

    cost = pl.CostEstimate(
        flops=2 * B * (D * Hp + Hp * Cp),
        transcendentals=B * (Hp + 2 * Cp + 1),
        bytes_accessed=4 * (B * D + Hp * D + Hp + Cp * Hp + Cp + Cp * B),
    )

    out_t = pl.pallas_call(
        kernel,
        out_shape=jax.ShapeDtypeStruct((Cp, B), jnp.float32),   # classes on sublanes
        grid=grid,
        in_specs=[
            pl.BlockSpec((tb, D), lambda i: (i, 0)),    # x: streamed per batch tile
            pl.BlockSpec((Hp, D), lambda i: (0, 0)),    # weights/biases: VMEM-resident
            pl.BlockSpec((Hp, 1), lambda i: (0, 0)),
            pl.BlockSpec((Cp, Hp), lambda i: (0, 0)),
            pl.BlockSpec((Cp, 1), lambda i: (0, 0)),
        ],
        out_specs=pl.BlockSpec((Cp, tb), lambda i: (0, i)),
        compiler_params=pltpu.CompilerParams(
            dimension_semantics=("parallel",),          # v7x: shard batch across 2 TCs
        ),
        cost_estimate=cost,
    )(x, w1t, b1t, w2t, b2t)

    return out_t[:C, :].T                               # (B, C)


def init_params(key, input_dim, h):
    # Deterministic init mimicking nn.Linear's U(-1/sqrt(fan_in), 1/sqrt(fan_in)).
    k1, k2, k3, k4 = jax.random.split(key, 4)
    bound1 = 1.0 / jnp.sqrt(input_dim)
    bound2 = 1.0 / jnp.sqrt(h)
    w1 = jax.random.uniform(k1, (input_dim, h), jnp.float32, -bound1, bound1)
    b1 = jax.random.uniform(k2, (1, h), jnp.float32, -bound1, bound1)
    w2 = jax.random.uniform(k3, (h, 2), jnp.float32, -bound2, bound2)
    b2 = jax.random.uniform(k4, (1, 2), jnp.float32, -bound2, bound2)
    return w1, b1, w2, b2


def reference_forward(x, w1, b1, w2, b2):
    z1 = jnp.tanh(x @ w1 + b1)
    z2 = jnp.tanh(z1 @ w2 + b2)
    return jax.nn.log_softmax(z2, axis=-1)


if __name__ == "__main__":
    key = jax.random.PRNGKey(0)
    kx, kp = jax.random.split(key)

    batch, input_dim, h = 8, 32, 32
    x = jax.random.normal(kx, (batch, input_dim), jnp.float32)
    w1, b1, w2, b2 = init_params(kp, input_dim, h)

    fwd = jax.jit(ffnn_forward)
    out = jax.block_until_ready(fwd(x, w1, b1, w2, b2))
    ref = reference_forward(x, w1, b1, w2, b2)
    assert out.shape == (batch, 2)
    assert jnp.allclose(out, ref, atol=1e-5, rtol=1e-5), "mismatch vs reference"

    # Exercise the multi-step path (grid > 1, balanced even tiles, ragged last tile).
    big_b = 2500
    xb = jax.random.normal(kx, (big_b, input_dim), jnp.float32)
    fwd_tiled = jax.jit(functools.partial(ffnn_forward, max_batch_tile=1024))
    out_big = jax.block_until_ready(fwd_tiled(xb, w1, b1, w2, b2))
    ref_big = reference_forward(xb, w1, b1, w2, b2)
    assert out_big.shape == (big_b, 2)
    assert jnp.allclose(out_big, ref_big, atol=1e-5, rtol=1e-5), "tiled mismatch"

    print("KERNEL_OK")
</pallas_src>

<mosaic_0001>
module attributes {stable_mosaic.version = 11 : i64} {
  func.func @_ffnn_kernel(%arg0: i32, %arg1: memref<8x32xf32, #tpu.memory_space<vmem>>, %arg2: memref<32x32xf32, #tpu.memory_space<vmem>>, %arg3: memref<32x1xf32, #tpu.memory_space<vmem>>, %arg4: memref<8x32xf32, #tpu.memory_space<vmem>>, %arg5: memref<8x1xf32, #tpu.memory_space<vmem>>, %arg6: memref<8x8xf32, #tpu.memory_space<vmem>>) attributes {dimension_semantics = [#tpu.dimension_semantics<parallel>], iteration_bounds = array<i64: 1>, scalar_prefetch = 0 : i64, scratch_operands = 0 : i64, tpu.core_type = #tpu.core_type<tc>, window_params = [{transform_indices = @transform_0, window_bounds = array<i64: 8, 32>}, {pipeline_mode = #tpu.pipeline_mode<synchronous>, transform_indices = @transform_1, window_bounds = array<i64: 32, 32>}, {pipeline_mode = #tpu.pipeline_mode<synchronous>, transform_indices = @transform_2, window_bounds = array<i64: 32, 1>}, {pipeline_mode = #tpu.pipeline_mode<synchronous>, transform_indices = @transform_3, window_bounds = array<i64: 8, 32>}, {pipeline_mode = #tpu.pipeline_mode<synchronous>, transform_indices = @transform_4, window_bounds = array<i64: 8, 1>}, {transform_indices = @transform_5, window_bounds = array<i64: 8, 8>}]} {
    %c0 = arith.constant 0 : index
    %c0_0 = arith.constant 0 : index
    %0 = vector.load %arg1[%c0, %c0_0] : memref<8x32xf32, #tpu.memory_space<vmem>>, vector<8x32xf32>
    %c0_1 = arith.constant 0 : index
    %c0_2 = arith.constant 0 : index
    %1 = vector.load %arg2[%c0_1, %c0_2] : memref<32x32xf32, #tpu.memory_space<vmem>>, vector<32x32xf32>
    %cst = arith.constant dense<0.000000e+00> : vector<32x8xf32>
    %2 = tpu.matmul %1, %0, %cst {dimension_numbers = #tpu.dot_dimension_numbers<[1], [1], [0], [0], [0, 0, 1, 0], [], []>} : vector<32x32xf32>, vector<8x32xf32>, vector<32x8xf32> -> vector<32x8xf32>
    %c0_3 = arith.constant 0 : index
    %c0_4 = arith.constant 0 : index
    %3 = vector.load %arg3[%c0_3, %c0_4] : memref<32x1xf32, #tpu.memory_space<vmem>>, vector<32x1xf32>
    %4 = vector.broadcast %3 : vector<32x1xf32> to vector<32x8xf32>
    %5 = arith.addf %2, %4 : vector<32x8xf32>
    %6 = math.tanh %5 : vector<32x8xf32>
    %c0_5 = arith.constant 0 : index
    %c0_6 = arith.constant 0 : index
    %7 = vector.load %arg4[%c0_5, %c0_6] : memref<8x32xf32, #tpu.memory_space<vmem>>, vector<8x32xf32>
    %cst_7 = arith.constant dense<0.000000e+00> : vector<8x8xf32>
    %8 = tpu.matmul %7, %6, %cst_7 {dimension_numbers = #tpu.dot_dimension_numbers<[1], [0], [0], [1], [0, 0, 1, 1], [], []>} : vector<8x32xf32>, vector<32x8xf32>, vector<8x8xf32> -> vector<8x8xf32>
    %c0_8 = arith.constant 0 : index
    %c0_9 = arith.constant 0 : index
    %9 = vector.load %arg5[%c0_8, %c0_9] : memref<8x1xf32, #tpu.memory_space<vmem>>, vector<8x1xf32>
    %10 = vector.broadcast %9 : vector<8x1xf32> to vector<8x8xf32>
    %11 = arith.addf %8, %10 : vector<8x8xf32>
    %12 = math.tanh %11 : vector<8x8xf32>
    %13 = tpu.iota {dimensions = array<i32: 0>} : vector<8x1xi32>
    %c2_i32 = arith.constant 2 : i32
    %14 = vector.broadcast %c2_i32 : i32 to vector<8x1xi32>
    %15 = arith.cmpi slt, %13, %14 : vector<8x1xi32>
    %16 = math.exp %12 : vector<8x8xf32>
    %cst_10 = arith.constant 0.000000e+00 : f32
    %17 = vector.shape_cast %15 : vector<8x1xi1> to vector<8x1xi1>
    %18 = vector.broadcast %17 : vector<8x1xi1> to vector<8x8xi1>
    %19 = vector.broadcast %cst_10 : f32 to vector<8x8xf32>
    %20 = arith.select %18, %16, %19 : vector<8x8xi1>, vector<8x8xf32>
    %cst_11 = arith.constant dense<0.000000e+00> : vector<8xf32>
    %21 = vector.multi_reduction <add>, %20, %cst_11 [0] : vector<8x8xf32> to vector<8xf32>
    %22 = vector.shape_cast %21 : vector<8xf32> to vector<1x8xf32>
    %23 = math.log %22 : vector<1x8xf32>
    %24 = vector.broadcast %23 : vector<1x8xf32> to vector<8x8xf32>
    %25 = arith.subf %12, %24 : vector<8x8xf32>
    %c0_12 = arith.constant 0 : index
    %c0_13 = arith.constant 0 : index
    %26 = vector.load %arg6[%c0_12, %c0_13] : memref<8x8xf32, #tpu.memory_space<vmem>>, vector<8x8xf32>
    tpu.vector_store %arg6[%c0_12, %c0_13], %25 {strides = array<i32>} : memref<8x8xf32, #tpu.memory_space<vmem>>, vector<8x8xf32>,
    return
  }
  func.func @transform_0(%arg0: i32) -> (i32, i32) {
    %c0_i32 = arith.constant 0 : i32
    %c0_i32_0 = arith.constant 0 : i32
    return %arg0, %c0_i32 : i32, i32
  }
  func.func @transform_1(%arg0: i32) -> (i32, i32) {
    %c0_i32 = arith.constant 0 : i32
    %c0_i32_0 = arith.constant 0 : i32
    %c0_i32_1 = arith.constant 0 : i32
    return %c0_i32, %c0_i32_0 : i32, i32
  }
  func.func @transform_2(%arg0: i32) -> (i32, i32) {
    %c0_i32 = arith.constant 0 : i32
    %c0_i32_0 = arith.constant 0 : i32
    %c0_i32_1 = arith.constant 0 : i32
    return %c0_i32, %c0_i32_0 : i32, i32
  }
  func.func @transform_3(%arg0: i32) -> (i32, i32) {
    %c0_i32 = arith.constant 0 : i32
    %c0_i32_0 = arith.constant 0 : i32
    %c0_i32_1 = arith.constant 0 : i32
    return %c0_i32, %c0_i32_0 : i32, i32
  }
  func.func @transform_4(%arg0: i32) -> (i32, i32) {
    %c0_i32 = arith.constant 0 : i32
    %c0_i32_0 = arith.constant 0 : i32
    %c0_i32_1 = arith.constant 0 : i32
    return %c0_i32, %c0_i32_0 : i32, i32
  }
  func.func @transform_5(%arg0: i32) -> (i32, i32) {
    %c0_i32 = arith.constant 0 : i32
    %c0_i32_0 = arith.constant 0 : i32
    return %c0_i32, %arg0 : i32, i32
  }
}

</mosaic_0001>

<bundles_post_ra>
// kernel: ffnn_forward.1
= control target key start
LH: loop header
LB: loop body
LE: loop exit
PB: predicated region body
PF: predicated region fallthrough
CT: control target
= control target key end

     0   :  { %vm49_vm0 = vcmask 261120   ;;  %v179_v1 = vmov 0   ;;  %v129_v31 = vlaneseq  ;;  %vm137_vm2 = vcmask 64512   ;;  %s254_s0 = inlined_call_operand.vmem [shape: f32[8,32], index: 0, kind: input, shape index: {}]   ;;  %s255_s1 = inlined_call_operand.vmem [shape: f32[32,32], index: 1, kind: input, shape index: {}]   ;;  %s256_s2 = inlined_call_operand.vmem [shape: f32[32,1], index: 2, kind: input, shape index: {}]   ;;  %s257_s4 = inlined_call_operand.vmem [shape: f32[8,1], index: 4, kind: input, shape index: {}]   ;;  %s258_s3 = inlined_call_operand.vmem [shape: f32[8,32], index: 3, kind: input, shape index: {}]   ;;  %s259_s5 = inlined_call_operand.vmem [shape: f32[8,8], index: 5, kind: output, shape index: {}]  }
   0x1   :  { %v20_v0 = vld [vmem:[%s254_s0] sm:$0xff]  ;;  %162 = vset.pattern.permute.xlu0 %v179_v1  ;;  %163 = vset.pattern.permute.xlu1 %v179_v1  ;;  %v22_v2 = vld [vmem:[%s255_s1 + $0x8] sm:$0xff]  ;;  %v24_v3 = vld [vmem:[%s255_s1 + $0x18] sm:$0xff] }
   0x2   :  { %159 = vmatpush.xpose.msk.msra.mxu2 %vm49_vm0, %v20_v0  ;;  %160 = vmatpush.xpose.msk.msra.mxu3 %vm49_vm0, %v20_v0  ;;  %v28_v4 = vld [vmem:[%s256_s2 + $0x18] sm:$0xff]  ;;  %v21_v5 = vld [vmem:[%s255_s1] sm:$0xff]  ;;  %v26_v6 = vld [vmem:[%s256_s2 + $0x8] sm:$0xff]  ;;  %v130_v34 = vshrl.u32 %v129_v31, 7 }
   0x3   :  { %153 = vmatpush.xpose.msk.msra.mxu0 %vm49_vm0, %v20_v0  ;;  %46 = vperm.xlu0 %162, %v28_v4   ;;  %v27_v7 = vld [vmem:[%s256_s2 + $0x10] sm:$0xff]  ;;  %v25_v8 = vld [vmem:[%s256_s2] sm:$0xff] }
   0x4   :  { %36 = vperm.xlu1 %163, %v26_v6   ;;  %164 = vset.pattern.permute.xlu2 %v179_v1  ;;  %v23_v9 = vld [vmem:[%s255_s1 + $0x10] sm:$0xff]  ;;  %v99_v10 = vld [vmem:[%s257_s4] sm:$0xff]  ;;  %vm131_vm1 = vcmp.lt.s32.totalorder %v130_v34, 2 }
   0x5   :  { %155 = vmatmul.msk.f32.vlgmr.msra.gmra.mxu2 %vm49_vm0, %v22_v2  ;;  %157 = vmatmul.msk.f32.vlgmr.msra.gmra.mxu3 %vm49_vm0, %v24_v3  ;;  %v98_v26 = vld [vmem:[%s258_s3] sm:$0xff] }
   0x6   :  { %154 = vmatmul.msk.f32.vlgmr.msra.gmra.mxu0 %vm49_vm0, %v21_v5  ;;  %102 = vperm.xlu2 %164, %v99_v10  }
   0xb   :  { %41 = vperm.xlu0 %162, %v27_v7  }
   0xc   :  { %31 = vperm.xlu1 %163, %v25_v8  }
   0xd   :  { %156 = vmatmul.msk.f32.gmra.mxu2 %vm49_vm0, %v23_v9 }
  0x60   :  { %v103_v28 = vpop.permute.xlu2 %102 }
  0x75   :  { %v47_v11 = vpop.permute.xlu0 %46 }
  0x76   :  { %v37_v12 = vpop.permute.xlu1 %36 }
  0x7d   :  { %v42_v16 = vpop.permute.xlu0 %41 }
  0x7e   :  { %v32_v17 = vpop.permute.xlu1 %31 }
  0x83   :  { %v82_v18 = vpop.f32.mrf.mxu0 }
  0x84   :  { %v83_v23 = vadd.f32 %v82_v18, %v32_v17 }
  0x88   :  { %v85_v13 = vpop.f32.mrf.mxu2  ;;  %v91_v14 = vpop.f32.mrf.mxu3 }
  0x89   :  { %v92_v15 = vadd.f32 %v91_v14, %v47_v11  ;;  %v86_v20 = vadd.f32 %v85_v13, %v37_v12 }
  0x8b   :  { %165 = vtanh.f32 %v92_v15 }
  0x90   :  { %v88_v19 = vpop.f32.mrf.mxu2 }
  0x91   :  { %v89_v21 = vadd.f32 %v88_v19, %v42_v16  ;;  %v166_v22 = vpop.eup %165 }
  0x92   :  { %120 = vmatpush.msra.mxu1 %v166_v22 }
  0x93   :  { %167 = vtanh.f32 %v89_v21 }
  0x94   :  { %169 = vtanh.f32 %v86_v20 }
  0x95   :  { %171 = vtanh.f32 %v83_v23 }
  0x99   :  { %v168_v24 = vpop.eup %167 }
  0x9a   :  { %121 = vmatpush.msra.mxu1 %v168_v24  ;;  %v170_v25 = vpop.eup %169 }
  0x9b   :  { %v172_v27 = vpop.eup %171 }
  0x9c   :  { %122 = vmatpush.msra.mxu1 %v170_v25 }
  0x9e   :  { %123 = vmatpush.msra.mxu1 %v172_v27 }
  0x9f   :  { %158 = vmatmul.msk.f32.vlgmr.msra.gmra.mxu1 %vm49_vm0, %v98_v26 }
 0x11c   :  { %v125_v29 = vpop.f32.mrf.mxu1 }
 0x11d   :  { %v126_v30 = vadd.f32 %v125_v29, %v103_v28 }
 0x11f   :  { %173 = vtanh.f32 %v126_v30 }
 0x125   :  { %v174_v32 = vpop.eup %173 }
 0x126   :  { %v132_v33 = vmul.f32 1.442695, %v174_v32 }
 0x128   :  { %175 = vpow2.f32 %v132_v33 }
 0x12e   :  { %v176_v35 = vpop.eup %175 }
 0x12f   :  { %v136_v36 = vsel %vm131_vm1, %v176_v35, 0.0 }
 0x130   :  { %v138_v37 = vsel %vm137_vm2, %v136_v36, 0.0 }
 0x131   :  { %v139_v38 = vrot.slane %v138_v37, 4 }
 0x133   :  { %v140_v39 = vadd.f32 %v139_v38, %v138_v37 }
 0x135   :  { %v141_v40 = vrot.slane %v140_v39, 2 }
 0x137   :  { %v142_v41 = vadd.f32 %v141_v40, %v140_v39 }
 0x139   :  { %v143_v42 = vrot.slane %v142_v41, 1 }
 0x13b   :  { %v144_v43 = vadd.f32 %v143_v42, %v142_v41 }
 0x13d   :  { %177 = vlog2.f32 %v144_v43 }
 0x143   :  { %v178_v44 = vpop.eup %177 }
 0x144   :  { %v146_v45 = vmul.f32 0.6931472, %v178_v44 }
 0x146   :  { %v147_v46 = vsub.f32 %v174_v32, %v146_v45 }
 0x148   :  { %148 = vst.msk [vmem:[%s259_s5] sm:$0xff] %vm137_vm2, %v147_v46 }

</bundles_post_ra>
